<compile_context>
chip_gen: v7x
topology: tpu7x:2x2x1
jax: 0.10.0
libtpu: 0.0.40
codegen_flags: <defaults>
</compile_context>

<pallas_src>
import jax
import jax.numpy as jnp
from jax.experimental import pallas as pl
from jax.experimental.pallas import tpu as pltpu


# ---------------------------------------------------------------------------
# Kernels
# ---------------------------------------------------------------------------

def _layer_norm_chunk(z, g, b, eps=1e-5):
    """Single-pass LayerNorm (f32 stats) + affine over the last axis of z."""
    c = z.shape[-1]
    inv_c = 1.0 / c
    s1 = jnp.sum(z, axis=-1, keepdims=True)
    s2 = jnp.sum(z * z, axis=-1, keepdims=True)
    mu = s1 * inv_c
    var = jnp.maximum(s2 * inv_c - mu * mu, 0.0)
    zn = (z - mu) * jax.lax.rsqrt(var + eps)
    return zn * g + b


def _patch_expand_kernel_fused(x_ref, w_ref, g_ref, b_ref, o_ref):
    """One grid step = one row-slab tile; BOTH p1 halves of the 2x2 shuffle.

    Used when dim % 128 == 0 so the y[:, p1*dim:(p1+1)*dim] splits are
    vreg-(lane-)aligned.

    x_ref : (rows, dim)      input tokens (rows = TH * W)
    w_ref : (dim, 2*dim)     bf16 expand weight, resident across grid steps
    g_ref : (1, dim)         LayerNorm gamma tiled over the two p2 chunks
    b_ref : (1, dim)         LayerNorm beta  tiled over the two p2 chunks
    o_ref : (TH, 2, W, dim)  pixel-shuffled output slab (both p1 halves)
    """
    dim = g_ref.shape[-1]
    c = dim // 2
    th, _, w_extent, _ = o_ref.shape

    # Hot path 1: one wide expand matmul on the MXU (f32 accumulation).
    x = x_ref[...].astype(w_ref.dtype)
    y = jnp.dot(x, w_ref[...], preferred_element_type=jnp.float32)  # (rows, 2*dim)

    # Hot path 2: per-c-chunk LayerNorm + affine, stored per p1 half.
    for p1 in range(2):                                   # static unroll
        yh = y[:, p1 * dim:(p1 + 1) * dim]                # lane-aligned (dim % 128 == 0)
        if c % 128 == 0:
            # Lane-aligned per-chunk stores: no concatenate copy, no masked vst.
            for p2 in range(2):
                res = _layer_norm_chunk(yh[:, p2 * c:(p2 + 1) * c],
                                        g_ref[:, p2 * c:(p2 + 1) * c],
                                        b_ref[:, p2 * c:(p2 + 1) * c])
                o_ref[:, p1:p1 + 1, :, p2 * c:(p2 + 1) * c] = (
                    res.reshape(th, 1, w_extent, c).astype(o_ref.dtype))
        else:
            # c < 128: keep a single lane-dense full-width store per half.
            halves = [
                _layer_norm_chunk(yh[:, p2 * c:(p2 + 1) * c],
                                  g_ref[:, p2 * c:(p2 + 1) * c],
                                  b_ref[:, p2 * c:(p2 + 1) * c])
                for p2 in range(2)]
            res = jnp.concatenate(halves, axis=-1)         # (rows, dim)
            o_ref[:, p1:p1 + 1] = (
                res.reshape(th, 1, w_extent, dim).astype(o_ref.dtype))


def _patch_expand_kernel_split(x_ref, w_ref, g_ref, b_ref, o_ref):
    """One grid step = one (row-slab tile, p1) pair; used when dim % 128 != 0.

    x_ref : (rows, dim)      input tokens (rows = TH * W)
    w_ref : (2, dim, dim)    stacked p1 halves of the expand weight (bf16)
    g_ref : (1, dim)         LayerNorm gamma tiled over the two p2 chunks
    b_ref : (1, dim)         LayerNorm beta  tiled over the two p2 chunks
    o_ref : (TH, 1, W, dim)  output slab for p1 = program_id(1)
    """
    p1 = pl.program_id(1)
    dim = g_ref.shape[-1]
    c = dim // 2
    th, _, w_extent, _ = o_ref.shape

    x = x_ref[...].astype(w_ref.dtype)
    y = jnp.dot(x, w_ref[p1], preferred_element_type=jnp.float32)   # (rows, dim)

    halves = [
        _layer_norm_chunk(y[:, p2 * c:(p2 + 1) * c],
                          g_ref[:, p2 * c:(p2 + 1) * c],
                          b_ref[:, p2 * c:(p2 + 1) * c])
        for p2 in range(2)]
    res = jnp.concatenate(halves, axis=-1)                           # (rows, dim)
    o_ref[...] = res.reshape(th, 1, w_extent, dim).astype(o_ref.dtype)


# ---------------------------------------------------------------------------
# One-time parameter preparation (hoisted out of the per-step forward)
# ---------------------------------------------------------------------------

def prepare_patch_expand_params(weight, gamma, beta, *, matmul_dtype=jnp.bfloat16):
    """
    weight : (dim, 2*dim)  -- nn.Linear(dim, 2*dim, bias=False) weight, transposed
                              so that y = x @ weight
    gamma  : (dim // 2,)   -- LayerNorm weight
    beta   : (dim // 2,)   -- LayerNorm bias
    """
    dim = weight.shape[0]
    assert weight.shape == (dim, 2 * dim), weight.shape
    assert dim % 2 == 0
    c = dim // 2
    assert gamma.shape == (c,) and beta.shape == (c,)

    fuse_p1 = (dim % 128 == 0)
    if fuse_p1:
        w_prep = weight.astype(matmul_dtype)                              # (dim, 2*dim)
    else:
        w_prep = jnp.stack([weight[:, :dim], weight[:, dim:]],
                           axis=0).astype(matmul_dtype)                   # (2, dim, dim)
    # LayerNorm affine, tiled across the two p2 chunks so it applies per half.
    g2 = jnp.concatenate([gamma, gamma]).reshape(1, dim).astype(jnp.float32)
    b2 = jnp.concatenate([beta, beta]).reshape(1, dim).astype(jnp.float32)
    return {"w": w_prep, "g": g2, "b": b2, "dim": dim, "fuse_p1": fuse_p1}


# ---------------------------------------------------------------------------
# Tiling / VMEM budgeting
# ---------------------------------------------------------------------------

def _vmem_capacity_bytes():
    try:
        cap = int(pltpu.get_tpu_info().vmem_capacity_bytes)
        if cap > 0:
            return cap
    except Exception:
        pass
    return 64 * 1024 * 1024     # conservative (v7x-sized) fallback


def _pick_row_slabs(num_slabs, w, vmem_of_rows, *, target_rows, vmem_budget):
    """Pick TH = number of (b, h) slabs per grid step.

    TH must divide num_slabs; TH*w must be a multiple of 8 (sublane rule)
    unless it equals the full row extent.  Prefer the largest tile that fits
    target_rows / VMEM budget and yields >= 2 even grid steps (so a v7x
    megacore split lands on the slab axis and stays balanced)."""
    legal = []
    for th in range(num_slabs, 0, -1):
        if num_slabs % th:
            continue
        rows = th * w
        if rows % 8 != 0 and th != num_slabs:
            continue
        legal.append(th)                        # descending: first fit = largest

    def fits(th):
        rows = th * w
        return rows <= target_rows and vmem_of_rows(rows) <= vmem_budget

    for need_even in (True, False):
        for th in legal:
            n_tiles = num_slabs // th
            if need_even and (n_tiles < 2 or n_tiles % 2):
                continue
            if fits(th):
                return th
    # Drop the target_rows / evenness preferences; keep the hard VMEM check.
    for th in legal:
        if vmem_of_rows(th * w) <= vmem_budget:
            return th
    raise ValueError(
        "PatchExpand: no legal row tile fits the VMEM budget "
        f"(num_slabs={num_slabs}, W={w}); consider padding W to a multiple of 8.")


# ---------------------------------------------------------------------------
# Forward wrappers
# ---------------------------------------------------------------------------

def patch_expand_apply(x, params, input_resolution, *, out_dtype=jnp.bfloat16):
    """
    x      : (B, H*W, dim)
    params : output of prepare_patch_expand_params
    returns: (B, 4*H*W, dim//2) in out_dtype (bf16 default: mem-bound kernel,
             the output is 2x the input element count, so bf16 output cuts
             total HBM traffic ~1/3).
    """
    H, W = input_resolution
    B, L, dim = x.shape
    assert L == H * W, "input feature has wrong size"
    assert dim == params["dim"]
    c = dim // 2
    num_slabs = B * H                       # one slab = one (b, h) row of W tokens
    fuse_p1 = params["fuse_p1"]
    w_prep, g2, b2 = params["w"], params["g"], params["b"]

    x2d = x.reshape(num_slabs * W, dim)
    x_bytes = x2d.dtype.itemsize
    out_bytes = jnp.dtype(out_dtype).itemsize
    w_bytes = jnp.dtype(w_prep.dtype).itemsize

    # Generation-aware VMEM budgeting (v7x: 64 MiB physical, v5e/v6e: 128 MiB).
    vmem_cap = _vmem_capacity_bytes()
    vmem_limit = int(min(0.75 * vmem_cap, 100 * 1024 * 1024))
    target_rows = 2048 if vmem_cap > 80 * 1024 * 1024 else 1024
    vmem_budget = int(0.80 * vmem_limit)
    w_resident = 2 * int(w_prep.size) * w_bytes     # weight (assume double-buffered)

    if fuse_p1:
        def vmem_of_rows(rows):
            return (2 * rows * dim * x_bytes                 # x tile (double-buffered)
                    + 2 * rows * 2 * dim * out_bytes         # out tile (double-buffered)
                    + 3 * rows * 2 * dim * 4                 # f32 y / normalized chain
                    + w_resident)
    else:
        def vmem_of_rows(rows):
            return (2 * rows * dim * x_bytes
                    + 2 * rows * dim * out_bytes
                    + 3 * rows * dim * 4
                    + w_resident)

    th = _pick_row_slabs(num_slabs, W, vmem_of_rows,
                         target_rows=target_rows, vmem_budget=vmem_budget)
    rows = th * W
    n_tiles = num_slabs // th

    m_tokens = num_slabs * W
    cost = pl.CostEstimate(
        flops=2 * m_tokens * dim * (2 * dim),
        transcendentals=4 * m_tokens,                        # one rsqrt per output chunk
        bytes_accessed=(m_tokens * dim * x_bytes
                        + m_tokens * 2 * dim * out_bytes
                        + dim * 2 * dim * w_bytes))

    if fuse_p1:
        out = pl.pallas_call(
            _patch_expand_kernel_fused,
            out_shape=jax.ShapeDtypeStruct((num_slabs, 2, W, dim), out_dtype),
            grid=(n_tiles,),
            in_specs=[
                pl.BlockSpec((rows, dim), lambda i: (i, 0)),        # x slab tile
                pl.BlockSpec((dim, 2 * dim), lambda i: (0, 0)),     # full weight, resident
                pl.BlockSpec((1, dim), lambda i: (0, 0)),           # gamma (tiled)
                pl.BlockSpec((1, dim), lambda i: (0, 0)),           # beta  (tiled)
            ],
            out_specs=pl.BlockSpec((th, 2, W, dim), lambda i: (i, 0, 0, 0)),
            compiler_params=pltpu.CompilerParams(
                dimension_semantics=("parallel",),
                vmem_limit_bytes=vmem_limit),
            cost_estimate=cost,
        )(x2d, w_prep, g2, b2)
    else:
        out = pl.pallas_call(
            _patch_expand_kernel_split,
            out_shape=jax.ShapeDtypeStruct((num_slabs, 2, W, dim), out_dtype),
            grid=(n_tiles, 2),
            in_specs=[
                pl.BlockSpec((rows, dim), lambda i, p1: (i, 0)),       # reused across p1
                pl.BlockSpec((2, dim, dim), lambda i, p1: (0, 0, 0)),  # both halves, resident
                pl.BlockSpec((1, dim), lambda i, p1: (0, 0)),
                pl.BlockSpec((1, dim), lambda i, p1: (0, 0)),
            ],
            out_specs=pl.BlockSpec((th, 1, W, dim), lambda i, p1: (i, p1, 0, 0)),
            compiler_params=pltpu.CompilerParams(
                # p1 "arbitrary": any megacore split lands on the slab axis,
                # preserving x reuse across the two p1 steps.
                dimension_semantics=("parallel", "arbitrary"),
                vmem_limit_bytes=vmem_limit),
            cost_estimate=cost,
        )(x2d, w_prep, g2, b2)

    # out[b*H + h, p1, w, p2*c + ch] == final[b, 2h + p1, 2w + p2, ch]; the
    # row-major linear order of (B*H, 2, W, 2c) equals that of (B, 2H, 2W, c),
    # so this reshape is metadata-only (no transpose, no extra HBM traffic).
    return out.reshape(B, 4 * H * W, c)


def patch_expand_forward(x, weight, gamma, beta, input_resolution, *,
                         matmul_dtype=jnp.bfloat16, out_dtype=jnp.bfloat16):
    """Convenience wrapper that preps params inline (prefer prepare+apply)."""
    params = prepare_patch_expand_params(weight, gamma, beta,
                                         matmul_dtype=matmul_dtype)
    return patch_expand_apply(x, params, input_resolution, out_dtype=out_dtype)


# ---------------------------------------------------------------------------
# Pure-JAX reference + self-test
# ---------------------------------------------------------------------------

def _reference(x, weight, gamma, beta, input_resolution, *,
               matmul_dtype=jnp.float32):
    """Pure-JAX reference of the PyTorch forward."""
    H, W = input_resolution
    B, L, dim = x.shape
    c = dim // 2
    y = jnp.dot(x.astype(matmul_dtype), weight.astype(matmul_dtype),
                preferred_element_type=jnp.float32)            # (B, L, 2*dim)
    y = y.reshape(B, H, W, 2, 2, c)
    y = jnp.transpose(y, (0, 1, 3, 2, 4, 5)).reshape(B, 4 * H * W, c)
    mu = jnp.mean(y, axis=-1, keepdims=True)
    var = jnp.mean((y - mu) ** 2, axis=-1, keepdims=True)
    return (y - mu) / jnp.sqrt(var + 1e-5) * gamma + beta


if __name__ == "__main__":
    B, H, W = 2, 8, 8
    key = jax.random.PRNGKey(0)

    # dim=64  -> split (two-step p1) path
    # dim=128 -> fused p1 path, concat store (c=64 < 128)
    # dim=256 -> fused p1 path, lane-aligned per-chunk stores (c=128)
    for dim in (64, 128, 256):
        c = dim // 2
        kx, kw, kg, kb, key = jax.random.split(key, 5)
        x = jax.random.normal(kx, (B, H * W, dim), dtype=jnp.float32)
        # nn.Linear(dim, 2*dim, bias=False): torch weight is (2*dim, dim); keep transposed.
        weight = jax.random.normal(kw, (dim, 2 * dim), dtype=jnp.float32) * 0.05
        gamma = 1.0 + 0.1 * jax.random.normal(kg, (c,), dtype=jnp.float32)
        beta = 0.1 * jax.random.normal(kb, (c,), dtype=jnp.float32)

        params = prepare_patch_expand_params(weight, gamma, beta)   # one-time prep

        out_bf16 = jax.block_until_ready(
            patch_expand_apply(x, params, (H, W)))                  # default bf16 output
        out_f32 = jax.block_until_ready(
            patch_expand_apply(x, params, (H, W), out_dtype=jnp.float32))

        assert out_bf16.shape == (B, 4 * H * W, c), out_bf16.shape
        assert out_bf16.dtype == jnp.bfloat16
        assert out_f32.dtype == jnp.float32

        ref_bf16 = _reference(x, weight, gamma, beta, (H, W),
                              matmul_dtype=jnp.bfloat16)
        ref_f32 = _reference(x, weight, gamma, beta, (H, W),
                             matmul_dtype=jnp.float32)

        # f32-output kernel vs reference with the same bf16-operand matmul:
        # validates the fused pixel shuffle + per-chunk LayerNorm indexing/math.
        err = float(jnp.max(jnp.abs(out_f32 - ref_bf16)))
        assert jnp.allclose(out_f32, ref_bf16, atol=3e-3, rtol=3e-3), (dim, err)

        # bf16-output kernel: add output-quantization tolerance.
        o = out_bf16.astype(jnp.float32)
        err = float(jnp.max(jnp.abs(o - ref_bf16)))
        assert jnp.allclose(o, ref_bf16, atol=3e-2, rtol=3e-2), (dim, err)

        # Fidelity vs. the pure-f32 forward (bf16 operands + bf16 output).
        err = float(jnp.max(jnp.abs(o - ref_f32)))
        assert jnp.allclose(o, ref_f32, atol=6e-2, rtol=6e-2), (dim, err)

    print("KERNEL_OK")
</pallas_src>

<mosaic_0001>
module attributes {stable_mosaic.version = 11 : i64} {
  func.func @_patch_expand_kernel_split(%arg0: i32, %arg1: i32, %arg2: memref<64x64xf32, #tpu.memory_space<vmem>>, %arg3: memref<2x64x64xbf16, #tpu.memory_space<vmem>>, %arg4: memref<1x64xf32, #tpu.memory_space<vmem>>, %arg5: memref<1x64xf32, #tpu.memory_space<vmem>>, %arg6: memref<8x1x8x64xbf16, #tpu.memory_space<vmem>>) attributes {dimension_semantics = [#tpu.dimension_semantics<parallel>, #tpu.dimension_semantics<arbitrary>], iteration_bounds = array<i64: 2, 2>, scalar_prefetch = 0 : i64, scratch_operands = 0 : i64, tpu.core_type = #tpu.core_type<tc>, window_params = [{transform_indices = @transform_0, window_bounds = array<i64: 64, 64>}, {pipeline_mode = #tpu.pipeline_mode<synchronous>, transform_indices = @transform_1, window_bounds = array<i64: 2, 64, 64>}, {pipeline_mode = #tpu.pipeline_mode<synchronous>, transform_indices = @transform_2, window_bounds = array<i64: 1, 64>}, {pipeline_mode = #tpu.pipeline_mode<synchronous>, transform_indices = @transform_3, window_bounds = array<i64: 1, 64>}, {transform_indices = @transform_4, window_bounds = array<i64: 8, 1, 8, 64>}]} {
    %c0 = arith.constant 0 : index
    %c0_0 = arith.constant 0 : index
    %0 = vector.load %arg2[%c0, %c0_0] : memref<64x64xf32, #tpu.memory_space<vmem>>, vector<64x64xf32>
    %1 = arith.truncf %0 : vector<64x64xf32> to vector<64x64xbf16>
    %2 = arith.index_cast %arg1 : i32 to index
    %c0_1 = arith.constant 0 : index
    %c0_2 = arith.constant 0 : index
    %3 = vector.load %arg3[%2, %c0_1, %c0_2] : memref<2x64x64xbf16, #tpu.memory_space<vmem>>, vector<1x64x64xbf16>
    %4 = vector.shape_cast %3 : vector<1x64x64xbf16> to vector<64x64xbf16>
    %cst = arith.constant dense<0.000000e+00> : vector<64x64xf32>
    %5 = tpu.matmul %1, %4, %cst {dimension_numbers = #tpu.dot_dimension_numbers<[1], [0], [0], [1], [0, 0, 1, 1], [], []>} : vector<64x64xbf16>, vector<64x64xbf16>, vector<64x64xf32> -> vector<64x64xf32>
    %6 = vector.extract_strided_slice %5 {offsets = [0, 0], sizes = [64, 32], strides = [1, 1]} : vector<64x64xf32> to vector<64x32xf32>
    %c0_3 = arith.constant 0 : index
    %c0_4 = arith.constant 0 : index
    %7 = vector.load %arg4[%c0_3, %c0_4] : memref<1x64xf32, #tpu.memory_space<vmem>>, vector<1x32xf32>
    %c0_5 = arith.constant 0 : index
    %c0_6 = arith.constant 0 : index
    %8 = vector.load %arg5[%c0_5, %c0_6] : memref<1x64xf32, #tpu.memory_space<vmem>>, vector<1x32xf32>
    %cst_7 = arith.constant dense<0.000000e+00> : vector<64xf32>
    %9 = vector.multi_reduction <add>, %6, %cst_7 [1] : vector<64x32xf32> to vector<64xf32>
    %10 = vector.shape_cast %9 : vector<64xf32> to vector<64x1xf32>
    %11 = arith.mulf %6, %6 : vector<64x32xf32>
    %cst_8 = arith.constant dense<0.000000e+00> : vector<64xf32>
    %12 = vector.multi_reduction <add>, %11, %cst_8 [1] : vector<64x32xf32> to vector<64xf32>
    %13 = vector.shape_cast %12 : vector<64xf32> to vector<64x1xf32>
    %cst_9 = arith.constant 3.125000e-02 : f32
    %14 = vector.broadcast %cst_9 : f32 to vector<64x1xf32>
    %15 = arith.mulf %10, %14 : vector<64x1xf32>
    %cst_10 = arith.constant 3.125000e-02 : f32
    %16 = vector.broadcast %cst_10 : f32 to vector<64x1xf32>
    %17 = arith.mulf %13, %16 : vector<64x1xf32>
    %18 = arith.mulf %15, %15 : vector<64x1xf32>
    %19 = arith.subf %17, %18 : vector<64x1xf32>
    %cst_11 = arith.constant 0.000000e+00 : f32
    %20 = vector.broadcast %cst_11 : f32 to vector<64x1xf32>
    %21 = arith.maximumf %19, %20 : vector<64x1xf32>
    %22 = vector.broadcast %15 : vector<64x1xf32> to vector<64x32xf32>
    %23 = arith.subf %6, %22 : vector<64x32xf32>
    %cst_12 = arith.constant 9.99999974E-6 : f32
    %24 = vector.broadcast %cst_12 : f32 to vector<64x1xf32>
    %25 = arith.addf %21, %24 : vector<64x1xf32>
    %26 = math.rsqrt %25 : vector<64x1xf32>
    %27 = vector.broadcast %26 : vector<64x1xf32> to vector<64x32xf32>
    %28 = arith.mulf %23, %27 : vector<64x32xf32>
    %29 = vector.broadcast %7 : vector<1x32xf32> to vector<64x32xf32>
    %30 = arith.mulf %28, %29 : vector<64x32xf32>
    %31 = vector.broadcast %8 : vector<1x32xf32> to vector<64x32xf32>
    %32 = arith.addf %30, %31 : vector<64x32xf32>
    %33 = vector.extract_strided_slice %5 {offsets = [0, 32], sizes = [64, 32], strides = [1, 1]} : vector<64x64xf32> to vector<64x32xf32>
    %c0_13 = arith.constant 0 : index
    %c32 = arith.constant 32 : index
    %34 = vector.load %arg4[%c0_13, %c32] : memref<1x64xf32, #tpu.memory_space<vmem>>, vector<1x32xf32>
    %c0_14 = arith.constant 0 : index
    %c32_15 = arith.constant 32 : index
    %35 = vector.load %arg5[%c0_14, %c32_15] : memref<1x64xf32, #tpu.memory_space<vmem>>, vector<1x32xf32>
    %cst_16 = arith.constant dense<0.000000e+00> : vector<64xf32>
    %36 = vector.multi_reduction <add>, %33, %cst_16 [1] : vector<64x32xf32> to vector<64xf32>
    %37 = vector.shape_cast %36 : vector<64xf32> to vector<64x1xf32>
    %38 = arith.mulf %33, %33 : vector<64x32xf32>
    %cst_17 = arith.constant dense<0.000000e+00> : vector<64xf32>
    %39 = vector.multi_reduction <add>, %38, %cst_17 [1] : vector<64x32xf32> to vector<64xf32>
    %40 = vector.shape_cast %39 : vector<64xf32> to vector<64x1xf32>
    %cst_18 = arith.constant 3.125000e-02 : f32
    %41 = vector.broadcast %cst_18 : f32 to vector<64x1xf32>
    %42 = arith.mulf %37, %41 : vector<64x1xf32>
    %cst_19 = arith.constant 3.125000e-02 : f32
    %43 = vector.broadcast %cst_19 : f32 to vector<64x1xf32>
    %44 = arith.mulf %40, %43 : vector<64x1xf32>
    %45 = arith.mulf %42, %42 : vector<64x1xf32>
    %46 = arith.subf %44, %45 : vector<64x1xf32>
    %cst_20 = arith.constant 0.000000e+00 : f32
    %47 = vector.broadcast %cst_20 : f32 to vector<64x1xf32>
    %48 = arith.maximumf %46, %47 : vector<64x1xf32>
    %49 = vector.broadcast %42 : vector<64x1xf32> to vector<64x32xf32>
    %50 = arith.subf %33, %49 : vector<64x32xf32>
    %cst_21 = arith.constant 9.99999974E-6 : f32
    %51 = vector.broadcast %cst_21 : f32 to vector<64x1xf32>
    %52 = arith.addf %48, %51 : vector<64x1xf32>
    %53 = math.rsqrt %52 : vector<64x1xf32>
    %54 = vector.broadcast %53 : vector<64x1xf32> to vector<64x32xf32>
    %55 = arith.mulf %50, %54 : vector<64x32xf32>
    %56 = vector.broadcast %34 : vector<1x32xf32> to vector<64x32xf32>
    %57 = arith.mulf %55, %56 : vector<64x32xf32>
    %58 = vector.broadcast %35 : vector<1x32xf32> to vector<64x32xf32>
    %59 = arith.addf %57, %58 : vector<64x32xf32>
    %60 = tpu.concatenate %32, %59 in 1 : vector<64x32xf32>, vector<64x32xf32> -> vector<64x64xf32>
    %61 = vector.shape_cast %60 : vector<64x64xf32> to vector<8x1x8x64xf32>
    %62 = arith.truncf %61 : vector<8x1x8x64xf32> to vector<8x1x8x64xbf16>
    %c0_22 = arith.constant 0 : index
    %c0_23 = arith.constant 0 : index
    %c0_24 = arith.constant 0 : index
    %c0_25 = arith.constant 0 : index
    %63 = vector.load %arg6[%c0_22, %c0_23, %c0_24, %c0_25] : memref<8x1x8x64xbf16, #tpu.memory_space<vmem>>, vector<8x1x8x64xbf16>
    tpu.vector_store %arg6[%c0_22, %c0_23, %c0_24, %c0_25], %62 {strides = array<i32>} : memref<8x1x8x64xbf16, #tpu.memory_space<vmem>>, vector<8x1x8x64xbf16>,
    return
  }
  func.func @transform_0(%arg0: i32, %arg1: i32) -> (i32, i32) {
    %c0_i32 = arith.constant 0 : i32
    %c0_i32_0 = arith.constant 0 : i32
    return %arg0, %c0_i32 : i32, i32
  }
  func.func @transform_1(%arg0: i32, %arg1: i32) -> (i32, i32, i32) {
    %c0_i32 = arith.constant 0 : i32
    %c0_i32_0 = arith.constant 0 : i32
    %c0_i32_1 = arith.constant 0 : i32
    %c0_i32_2 = arith.constant 0 : i32
    return %c0_i32, %c0_i32_0, %c0_i32_1 : i32, i32, i32
  }
  func.func @transform_2(%arg0: i32, %arg1: i32) -> (i32, i32) {
    %c0_i32 = arith.constant 0 : i32
    %c0_i32_0 = arith.constant 0 : i32
    %c0_i32_1 = arith.constant 0 : i32
    return %c0_i32, %c0_i32_0 : i32, i32
  }
  func.func @transform_3(%arg0: i32, %arg1: i32) -> (i32, i32) {
    %c0_i32 = arith.constant 0 : i32
    %c0_i32_0 = arith.constant 0 : i32
    %c0_i32_1 = arith.constant 0 : i32
    return %c0_i32, %c0_i32_0 : i32, i32
  }
  func.func @transform_4(%arg0: i32, %arg1: i32) -> (i32, i32, i32, i32) {
    %c0_i32 = arith.constant 0 : i32
    %c0_i32_0 = arith.constant 0 : i32
    %c0_i32_1 = arith.constant 0 : i32
    return %arg0, %arg1, %c0_i32, %c0_i32_0 : i32, i32, i32, i32
  }
}

</mosaic_0001>

<bundles_post_ra>
// kernel: tpu_custom_call.1
= control target key start
LH: loop header
LB: loop body
LE: loop exit
PB: predicated region body
PF: predicated region fallthrough
CT: control target
= control target key end

     0   :  { %9 = vsyncpa [#allocation3], 0  ;;  %s1536_s0 = inlined_call_operand.vmem [shape: f32[128,64], index: 0, kind: input, shape index: {}]   ;;  %s1537_s1 = inlined_call_operand.vmem [shape: bf16[2,64,64], index: 1, kind: input, shape index: {}]   ;;  %s1538_s2 = inlined_call_operand.vmem [shape: f32[1,64], index: 2, kind: input, shape index: {}]   ;;  %s1539_s3 = inlined_call_operand.vmem [shape: f32[1,64], index: 3, kind: input, shape index: {}]   ;;  %s1540_s4 = inlined_call_operand.hbm [shape: bf16[16,2,8,64], index: 4, kind: output, shape index: {}]  }
   0x1   :  { %11 = vsyncpa [#allocation3 + $0x1], 0  ;;  %s1113_s15 = smov 0   ;;  %s1115_s16 = smov 0  }
   0x2   :  { %s1117_s17 = smov 0   ;;  %s1119_s18 = smov 0  }
   0x3   :  { %s1121_s19 = smov 0   ;;  %s1123_s20 = smov 0  }
   0x4   :  { %s1125_s21 = smov 0   ;;  %s1127_s22 = smov 0  }
   0x5 LB: > { %s816_s23 = sadd.s32 4294967295, %s1081_s22   ;;  %s817_s24 = sadd.s32 4294967294, %s1081_s22   ;;  %s1081_s22 = sphi %s1127_s22, %s17_s22   ;;  %s1077_s21 = sphi %s1125_s21, %s1549_s21   ;;  %s1073_s20 = sphi %s1123_s20, %s1548_s20   ;;  %s1069_s19 = sphi %s1121_s19, %s1547_s19   ;;  %s1065_s18 = sphi %s1119_s18, %s1546_s18   ;;  %s1061_s17 = sphi %s1117_s17, %s1545_s17   ;;  %s1057_s16 = sphi %s1115_s16, %s1544_s16   ;;  %s1053_s15 = sphi %s1113_s15, %s1543_s15  }
   0x6   : > { %s26_s25 = sadd.s32 1, %s1073_s20  ;;  %s29_s26 = sadd.s32 1, %s1077_s21 }
   0x7   : > { %p27_p0 = scmp.ge.s32.totalorder %s26_s25, 2  ;;  %p137_p1 = scmp.ne.s32.totalorder %s1061_s17, %s1057_s16 }
   0x8   : > { %p138_p2 = scmp.eq.s32.totalorder %s816_s23, 3  ;;  %p143_p5 = scmp.ne.s32.totalorder %s1057_s16, %s1053_s15 }
   0x9   : > { %s1551_s25 = smov (%p27_p0, %s26_s25), 0  ;;  %s1553_s26 = smov (!%p27_p0, %s29_s26), %s1077_s21 }
   0xa   : > { %s123_s27 = ssub.s32 %s1073_s20, %s1551_s25  ;;  %p1164_p3 = por %p138_p2, %p137_p1 }
   0xb   : > { %p31_p4 = scmp.ge.s32.totalorder %s1553_s26, 2  ;;  %p144_p6 = scmp.eq.s32.totalorder %s817_s24, 3 }
   0xc   : > { %p820_p7 = scmp.ge.s32.totalorder %s1081_s22, 1  ;;  %p180_p9 = scmp.lt.s32.totalorder %s1081_s22, 5 }
   0xd   : > { %s1555_s26 = smov (%p31_p4, %s1553_s26), 0  ;;  %p1173_p8 = por %p144_p6, %p143_p5 }
   0xe   : > { %s122_s30 = ssub.s32 %s1077_s21, %s1555_s26  ;;  %s127_s5 = sadd.s32 1, %s1061_s17 }
   0xf   : > { %s124_s6 = sor.u32 %s123_s27, %s122_s30  ;;  %p181_p10 = pnand %p820_p7, %p180_p9 }
  0x10   : > { %p125_p11 = scmp.eq.s32.totalorder %s124_s6, 0  ;;  %s842_s8 = sshll.u32 (!%p181_p10), %s1065_s18, 5  ;;  %vm261_vm0 = vcmask (!%p181_p10), 523264   ;;  %vm341_vm1 = vcmask (!%p181_p10), 261120   ;;  %vm714_vm2 = vcmask (!%p181_p10), 519168  }
  0x11   : > { %184 = sbr.rel (%p181_p10) target bundleno = 744 (0x2e8), region = 36  ;;  %s822_s9 = sshll.u32 (!%p181_p10), %s1069_s19, 3 }
  0x12   : > { %s1182_s7 = scalar_select %p125_p11, %s1061_s17, %s127_s5  }
  0x13   : > { %s228_s12 = scalar_lea.vmem (!%p181_p10), %s1537_s1, %s842_s8  ;;  %p207_p12 = scmp.lt.s32.totalorder (!%p181_p10), %s822_s9, 15 }
  0x14   : > { %v951_v0 = vld [vmem:[%s228_s12] sm:$0xff] (!%p181_p10)   ;;  %v952_v1 = vld [vmem:[%s228_s12 + $0x8] sm:$0xff] (!%p181_p10)   ;;  %v953_v2 = vld [vmem:[%s228_s12 + $0x10] sm:$0xff] (!%p181_p10)   ;;  %s1083_s27 = smov (!%p181_p10), 96   ;;  %s203_s6 = sand.u32 (!%p181_p10), 1, %s1057_s16  }
  0x15   : > { %852 = vmatprep.subr.bf16.mxu0 (!%p181_p10), %v951_v0  ;;  %868 = vmatprep.subr.bf16.mxu1 (!%p181_p10), %v951_v0  ;;  %v954_v9 = vld [vmem:[%s228_s12 + $0x18] sm:$0xff] (!%p181_p10)   ;;  %s821_s10 = sshll.u32 (!%p181_p10), %s203_s6, 5  ;;  %s843_s12 = sshll.u32 (!%p181_p10), %s1069_s19, 4 }
  0x16   : > { %853 = vmatpush3.bf16.msra.mxu0 (!%p181_p10), %v951_v0  ;;  %872 = vmatpush3.bf16.msra.mxu1 (!%p181_p10), %v951_v0  ;;  %s1410_s11 = scalar_lea.vmem (!%p181_p10), [#allocation2], %s821_s10  ;;  %s1084_s5 = smov (!%p181_p10), [#allocation2]  }
  0x17   : > { %854 = vmatprep.subr.bf16.mxu0 (!%p181_p10), %v952_v1  ;;  %869 = vmatprep.subr.bf16.mxu1 (!%p181_p10), %v952_v1  ;;  %s739_s19 = sshll.u32 (!%p181_p10), %s1410_s11, 4  ;;  %s991_s8 = sshll.u32 (!%p181_p10), %s1084_s5, 4  ;;  %s1478_s19 = int_to_ptr.vmem [resolvable:$true] %s739_s19  ;;  %s992_s8 = int_to_ptr.vmem [resolvable:$false] %s991_s8 }
  0x18   : > { %s1557_s9 = smov (!%p207_p12, %s822_s9), 15  ;;  %s987_s30 = scalar_lea.vmem %s1478_s19, 512 }
  0x19   : > { %s823_s13 = sshll.u32 %s1557_s9, 3  ;;  %p988_p13 = scmp.ne.s32.totalorder %s1478_s19, %s987_s30 }
  0x1a   : > { %s210_s24 = scalar_lea.vmem %s1536_s0, %s823_s13  ;;  %855 = vmatpush3.bf16.msra.mxu0 %v952_v1  ;;  %873 = vmatpush3.bf16.msra.mxu1 %v952_v1  ;;  %s736_s13 = sadd.s32 %s1065_s18, %s843_s12 }
  0x1b   : > { %v214_v3 = vld [vmem:[%s210_s24] sm:$0xff]  ;;  %v215_v4 = vld [vmem:[%s210_s24 + $0x8] sm:$0xff]  ;;  %856 = vmatprep.subr.bf16.mxu0 %v953_v2  ;;  %870 = vmatprep.subr.bf16.mxu1 %v953_v2  ;;  %v216_v10 = vld [vmem:[%s210_s24 + $0x10] sm:$0xff]  ;;  %s839_s18 = sshll.u32 %s736_s13, 6  ;;  %p989_p0 = pnand %p988_p13, %p1164_p3 }
  0x1c   : > { %v218_v5 = vld [vmem:[%s210_s24 + $0x20] sm:$0xff]  ;;  %v222_v6 = vpack.c.bf16 %v215_v4, %v214_v3  ;;  %v219_v7 = vld [vmem:[%s210_s24 + $0x28] sm:$0xff]  ;;  %v217_v11 = vld [vmem:[%s210_s24 + $0x18] sm:$0xff]  ;;  %s993_s9 = scalar_lea.vmem %s992_s8, 1024  ;;  %p994_p2 = scmp.lt.s32.totalorder %s1478_s19, %s992_s8 }
  0x1d   : > { %v224_v8 = vpack.c.bf16 %v219_v7, %v218_v5  ;;  %v220_v12 = vld [vmem:[%s210_s24 + $0x30] sm:$0xff]  ;;  %v221_v13 = vld [vmem:[%s210_s24 + $0x38] sm:$0xff]  ;;  %v223_v14 = vpack.c.bf16 %v217_v11, %v216_v10  ;;  %s1475_s24 = scalar_lea.hbm %s1540_s4, %s839_s18  ;;  %p990_p1 = pneg %p989_p0 }
  0x1e   : > { %860 = vmatprep.mubr.msk.bf16.mxu0 %vm261_vm0, %v222_v6  ;;  %857 = vmatpush3.bf16.msra.mxu0 %v953_v2  ;;  %v225_v15 = vpack.c.bf16 %v221_v13, %v220_v12  ;;  %p995_p4 = scmp.lt.s32.totalorder %s993_s9, %s987_s30 }
  0x1f   : > { %864 = vmatprep.mubr.msk.bf16.mxu1 %vm261_vm0, %v224_v8  ;;  %874 = vmatpush3.bf16.msra.mxu1 %v953_v2 }
  0x20   : > { %858 = vmatprep.subr.bf16.mxu0 %v954_v9  ;;  %871 = vmatprep.subr.bf16.mxu1 %v954_v9  ;;  %p996_p5 = por %p995_p4, %p994_p2 }
  0x22   : > { %859 = vmatpush3.bf16.msra.mxu0 %v954_v9  ;;  %p997_p6 = pnand %p996_p5, %p990_p1 }
  0x23   : > { %875 = vmatpush3.bf16.msra.mxu1 %v954_v9 }
  0x25   : > { %861 = vmatmul.mubr.msk.bf16.vlgmr.msra.gmra.mrb[0].mxu0 %vm261_vm0, %v223_v14 }
  0x26   : > { %865 = vmatmul.mubr.msk.bf16.vlgmr.msra.gmra.mrb[0].mxu1 %vm261_vm0, %v225_v15 }
  0xf8   : > { %v1196_v16 = vpop.f32.mrb[0].mxu0 }
  0xf9   : > { %v1198_v17 = vpop.f32.mrb[0].mxu1  ;;  %510 = vrot.lane.b32.xlu1 %v1196_v16, %s1083_s27  ;;  %v1204_v18 = vpop.f32.mrb[1].mxu0  ;;  %v348_v25 = vsel %vm341_vm1, %v1196_v16, 0.0  ;;  %v368_v26 = vmul.f32 %v1196_v16, %v1196_v16 }
  0xfa   : > { %518 = vrot.lane.b32.xlu0 %v1198_v17, %s1083_s27  ;;  %v1206_v19 = vpop.f32.mrb[1].mxu1  ;;  %v1208_v20 = vpop.f32.mrb[2].mxu0  ;;  %v360_v24 = vsel %vm341_vm1, %v1198_v17, 0.0  ;;  %v372_v27 = vmul.f32 %v1198_v17, %v1198_v17  ;;  %v342_v29 = vsel %vm341_vm1, %v1204_v18, 0.0  ;;  %v366_v32 = vmul.f32 %v1204_v18, %v1204_v18 }
  0xfb   : > { %v1210_v21 = vpop.f32.mrb[2].mxu1  ;;  %v1212_v22 = vpop.f32.mrb[3].mxu0  ;;  %v354_v28 = vsel %vm341_vm1, %v1206_v19, 0.0  ;;  %v369_v30 = vmul.f32 %v1208_v20, %v1208_v20  ;;  %v370_v33 = vmul.f32 %v1206_v19, %v1206_v19  ;;  %v351_v35 = vsel %vm341_vm1, %v1208_v20, 0.0 }
  0xfc   : > { %v1214_v23 = vpop.f32.mrb[3].mxu1  ;;  %v373_v31 = vmul.f32 %v1210_v21, %v1210_v21  ;;  %v345_v34 = vsel %vm341_vm1, %v1212_v22, 0.0  ;;  %v363_v36 = vsel %vm341_vm1, %v1210_v21, 0.0  ;;  %v367_v40 = vmul.f32 %v1212_v22, %v1212_v22 }
  0xfd   : > { %v357_v37 = vsel %vm341_vm1, %v1214_v23, 0.0  ;;  %v383_v39 = vsel %vm341_vm1, %v369_v30, 0.0  ;;  %v371_v44 = vmul.f32 %v1214_v23, %v1214_v23  ;;  %v374_v58 = vsel %vm341_vm1, %v366_v32, 0.0 }
  0xfe   : > { %506 = vrot.lane.b32.xlu0 %v1204_v18, %s1083_s27  ;;  %v395_v42 = vsel %vm341_vm1, %v373_v31, 0.0  ;;  %v377_v46 = vsel %vm341_vm1, %v367_v40, 0.0  ;;  %v380_v59 = vsel %vm341_vm1, %v368_v26, 0.0  ;;  %v386_v60 = vsel %vm341_vm1, %v370_v33, 0.0 }
  0xff   : > { %v389_v51 = vsel %vm341_vm1, %v371_v44, 0.0  ;;  %v392_v61 = vsel %vm341_vm1, %v372_v27, 0.0 }
 0x102   : > { %514 = vrot.lane.b32.xlu0 %v1206_v19, %s1083_s27 }
 0x11d   : > { %361 = vadd.xlane.f32.xlu1 %v360_v24 }
 0x121   : > { %349 = vadd.xlane.f32.xlu0 %v348_v25 }
 0x12e   : > { %512 = vrot.lane.b32.xlu1 %v1208_v20, %s1083_s27 }
 0x132   : > { %520 = vrot.lane.b32.xlu1 %v1210_v21, %s1083_s27 }
 0x137   : > { %566 = vrot.lane.b32.xlu0 %v368_v26, %s1083_s27 }
 0x13b   : > { %574 = vrot.lane.b32.xlu0 %v372_v27, %s1083_s27 }
 0x156   : > { %355 = vadd.xlane.f32.xlu1 %v354_v28 }
 0x15a   : > { %343 = vadd.xlane.f32.xlu0 %v342_v29 }
 0x167   : > { %516 = vrot.lane.b32.xlu1 %v1214_v23, %s1083_s27 }
 0x16b   : > { %568 = vrot.lane.b32.xlu1 %v369_v30, %s1083_s27  ;;  %v511_v43 = vpop.permute.xlu1 %510 }
 0x16c   : > { %v519_v38 = vpop.permute.xlu0 %518  ;;  %v536_v62 = vsel %vm341_vm1, %v511_v43, 0.0 }
 0x16d   : > { %v548_v0 = vsel %vm341_vm1, %v519_v38, 0.0 }
 0x16f   : > { %576 = vrot.lane.b32.xlu1 %v373_v31, %s1083_s27 }
 0x170   : > { %508 = vrot.lane.b32.xlu0 %v1212_v22, %s1083_s27  ;;  %v507_v41 = vpop.permute.xlu0 %506 }
 0x171   : > { %v530_v3 = vsel %vm341_vm1, %v507_v41, 0.0 }
 0x174   : > { %562 = vrot.lane.b32.xlu0 %v366_v32, %s1083_s27  ;;  %v515_v45 = vpop.permute.xlu0 %514 }
 0x175   : > { %v542_v8 = vsel %vm341_vm1, %v515_v45, 0.0 }
 0x178   : > { %570 = vrot.lane.b32.xlu0 %v370_v33, %s1083_s27 }
 0x193   : > { %346 = vadd.xlane.f32.xlu1 %v345_v34 }
 0x197   : > { %352 = vadd.xlane.f32.xlu0 %v351_v35 }
 0x19b   : > { %364 = vadd.xlane.f32.xlu0 %v363_v36 }
 0x19f   : > { %358 = vadd.xlane.f32.xlu0 %v357_v37 }
 0x1a3   : > { %384 = vadd.xlane.f32.xlu0 %v383_v39 }
 0x1a4   : > { %564 = vrot.lane.b32.xlu1 %v367_v40, %s1083_s27 }
 0x1a7   : > { %396 = vadd.xlane.f32.xlu0 %v395_v42 }
 0x1a8   : > { %572 = vrot.lane.b32.xlu1 %v371_v44, %s1083_s27  ;;  %s1484_s27 = scalar_lea.sflag [#allocation3], %s203_s6 }
 0x1aa   : > { %v362_v47 = vpop.xlane.xlu1 %361 }
 0x1ab   : > { %378 = vadd.xlane.f32.xlu0 %v377_v46  ;;  %v1271_v48 = vmul.f32 0.03125, %v362_v47 }
 0x1ad   : > { %v444_v49 = vsub.f32 %v1198_v17, %v1271_v48 }
 0x1ae   : > { %v350_v50 = vpop.xlane.xlu0 %349  ;;  %v513_v53 = vpop.permute.xlu1 %512 }
 0x1af   : > { %v1276_v52 = vmul.f32 0.03125, %v350_v50  ;;  %390 = vadd.xlane.f32.xlu0 %v389_v51  ;;  %v539_v55 = vsel %vm341_vm1, %v513_v53, 0.0 }
 0x1b1   : > { %v440_v54 = vsub.f32 %v1196_v16, %v1276_v52 }
 0x1b2   : > { %v521_v56 = vpop.permute.xlu1 %520  ;;  %v567_v63 = vpop.permute.xlu0 %566 }
 0x1b3   : > { %540 = vadd.xlane.f32.xlu0 %v539_v55  ;;  %v551_v57 = vsel %vm341_vm1, %v521_v56, 0.0  ;;  %v592_v13 = vsel %vm341_vm1, %v567_v63, 0.0 }
 0x1b6   : > { %v575_v1 = vpop.permute.xlu0 %574 }
 0x1b7   : > { %552 = vadd.xlane.f32.xlu0 %v551_v57  ;;  %v604_v29 = vsel %vm341_vm1, %v575_v1, 0.0 }
 0x1cc   : > { %375 = vadd.xlane.f32.xlu1 %v374_v58 }
 0x1d0   : > { %381 = vadd.xlane.f32.xlu1 %v380_v59 }
 0x1d4   : > { %387 = vadd.xlane.f32.xlu1 %v386_v60 }
 0x1d8   : > { %393 = vadd.xlane.f32.xlu1 %v392_v61 }
 0x1dc   : > { %537 = vadd.xlane.f32.xlu1 %v536_v62 }
 0x1e0   : > { %549 = vadd.xlane.f32.xlu1 %v548_v0 }
 0x1e3   : > { %v356_v2 = vpop.xlane.xlu1 %355 }
 0x1e4   : > { %v1289_v4 = vmul.f32 0.03125, %v356_v2  ;;  %531 = vadd.xlane.f32.xlu1 %v530_v3 }
 0x1e6   : > { %v442_v5 = vsub.f32 %v1206_v19, %v1289_v4 }
 0x1e7   : > { %v344_v6 = vpop.xlane.xlu0 %343  ;;  %v517_v10 = vpop.permute.xlu1 %516 }
 0x1e8   : > { %v1293_v7 = vmul.f32 0.03125, %v344_v6  ;;  %543 = vadd.xlane.f32.xlu1 %v542_v8  ;;  %v545_v15 = vsel %vm341_vm1, %v517_v10, 0.0 }
 0x1ea   : > { %v438_v9 = vsub.f32 %v1204_v18, %v1293_v7 }
 0x1eb   : > { %v509_v11 = vpop.permute.xlu0 %508  ;;  %v569_v25 = vpop.permute.xlu1 %568 }
 0x1ec   : > { %v533_v12 = vsel %vm341_vm1, %v509_v11, 0.0  ;;  %593 = vadd.xlane.f32.xlu1 %v592_v13  ;;  %v595_v27 = vsel %vm341_vm1, %v569_v25, 0.0 }
 0x1ed   : > { %534 = vadd.xlane.f32.xlu0 %v533_v12 }
 0x1ef   : > { %v563_v14 = vpop.permute.xlu0 %562  ;;  %v577_v30 = vpop.permute.xlu1 %576 }
 0x1f0   : > { %v586_v24 = vsel %vm341_vm1, %v563_v14, 0.0  ;;  %v607_v44 = vsel %vm341_vm1, %v577_v30, 0.0 }
 0x1f1   : > { %546 = vadd.xlane.f32.xlu0 %v545_v15  ;;  %587 = vadd.xlane.f32.xlu1 %v586_v24 }
 0x1f3   : > { %v571_v26 = vpop.permute.xlu0 %570 }
 0x1f4   : > { %v598_v28 = vsel %vm341_vm1, %v571_v26, 0.0 }
 0x1f5   : > { %596 = vadd.xlane.f32.xlu0 %v595_v27  ;;  %599 = vadd.xlane.f32.xlu1 %v598_v28  ;;  %v414_v28 = vmul.f32 %v1293_v7, %v1293_v7 }
 0x1f9   : > { %605 = vadd.xlane.f32.xlu1 %v604_v29 }
 0x220   : > { %v347_v31 = vpop.xlane.xlu1 %346 }
 0x221   : > { %v399_v32 = vmul.f32 0.03125, %v347_v31 }
 0x223   : > { %v439_v33 = vsub.f32 %v1212_v22, %v399_v32  ;;  %v415_v56 = vmul.f32 %v399_v32, %v399_v32  ;;  %v416_v32 = vmul.f32 %v1276_v52, %v1276_v52 }
 0x224   : > { %v1306_v34 = vpop.xlane.xlu0 %352  ;;  %v565_v35 = vpop.permute.xlu1 %564 }
 0x225   : > { %v589_v36 = vsel %vm341_vm1, %v565_v35, 0.0 }
 0x226   : > { %590 = vadd.xlane.f32.xlu0 %v589_v36 }
 0x228   : > { %v365_v37 = vpop.xlane.xlu0 %364  ;;  %v573_v39 = vpop.permute.xlu1 %572 }
 0x229   : > { %v405_v38 = vmul.f32 0.03125, %v365_v37  ;;  %v601_v40 = vsel %vm341_vm1, %v573_v39, 0.0 }
 0x22a   : > { %602 = vadd.xlane.f32.xlu0 %v601_v40 }
 0x22b   : > { %v445_v41 = vsub.f32 %v1210_v21, %v405_v38  ;;  %v421_v50 = vmul.f32 %v405_v38, %v405_v38 }
 0x22c   : > { %v359_v42 = vpop.xlane.xlu0 %358 }
 0x22d   : > { %v403_v43 = vmul.f32 0.03125, %v359_v42 }
 0x22e   : > { %608 = vadd.xlane.f32.xlu0 %v607_v44 }
 0x22f   : > { %v443_v45 = vsub.f32 %v1214_v23, %v403_v43  ;;  %v419_v62 = vmul.f32 %v403_v43, %v403_v43 }
 0x230   : > { %v1313_v46 = vpop.xlane.xlu0 %384 }
 0x234   : > { %v397_v47 = vpop.xlane.xlu0 %396 }
 0x235   : > { %v413_v51 = vmul.f32 0.03125, %v397_v47 }
 0x237   : > { %v429_v53 = vsub.f32 %v413_v51, %v421_v50 }
 0x238   : > { %v379_v55 = vpop.xlane.xlu0 %378 }
 0x239   : > { %v437_v57 = vmax.f32 %v429_v53, 0.0  ;;  %v407_v58 = vmul.f32 0.03125, %v379_v55 }
 0x23b   : > { %v453_v59 = vadd.f32 1e-05, %v437_v57  ;;  %v423_v60 = vsub.f32 %v407_v58, %v415_v56 }
 0x23c   : > { %v391_v61 = vpop.xlane.xlu0 %390 }
 0x23d   : > { %955 = vrsqrt.f32 %v453_v59  ;;  %v431_v63 = vmax.f32 %v423_v60, 0.0  ;;  %v411_v0 = vmul.f32 0.03125, %v391_v61 }
 0x23f   : > { %v447_v1 = vadd.f32 1e-05, %v431_v63  ;;  %v427_v2 = vsub.f32 %v411_v0, %v419_v62  ;;  %v1341_v62 = vmul.f32 0.03125, %v1306_v34 }
 0x240   : > { %v1315_v3 = vpop.xlane.xlu0 %540 }
 0x241   : > { %957 = vrsqrt.f32 %v447_v1  ;;  %v435_v6 = vmax.f32 %v427_v2, 0.0  ;;  %v409_v1 = vmul.f32 0.03125, %v1313_v46 }
 0x243   : > { %v451_v8 = vadd.f32 1e-05, %v435_v6  ;;  %v417_v6 = vmul.f32 %v1341_v62, %v1341_v62 }
 0x244   : > { %v553_v10 = vpop.xlane.xlu0 %552 }
 0x245   : > { %959 = vrsqrt.f32 %v451_v8  ;;  %v1317_v11 = vmul.f32 0.03125, %v553_v10  ;;  %v425_v34 = vsub.f32 %v409_v1, %v417_v6  ;;  %v1380_v1 = vld [vmem:[%s1538_s2] ss:$0 sm:$0xff] }
 0x247   : > { %v956_v12 = vpop.eup %955  ;;  %v657_v13 = vsub.f32 %v1210_v21, %v1317_v11 }
 0x248   : > { %v1321_v14 = vmul.f32 %v956_v12, %v445_v41 }
 0x24b   : > { %v958_v15 = vpop.eup %957 }
 0x24c   : > { %v1323_v24 = vmul.f32 %v958_v15, %v439_v33  ;;  %v418_v33 = vmul.f32 %v1289_v4, %v1289_v4  ;;  %v1362_v4 = vmul.f32 0.03125, %v1315_v3 }
 0x24f   : > { %v960_v25 = vpop.eup %959 }
 0x250   : > { %v1325_v26 = vmul.f32 %v960_v25, %v443_v45  ;;  %v420_v45 = vmul.f32 %v1271_v48, %v1271_v48 }
 0x259   : > { %v376_v27 = vpop.xlane.xlu1 %375 }
 0x25a   : > { %v406_v29 = vmul.f32 0.03125, %v376_v27  ;;  %v433_v27 = vmax.f32 %v425_v34, 0.0 }
 0x25c   : > { %v422_v30 = vsub.f32 %v406_v29, %v414_v28 }
 0x25d   : > { %v382_v31 = vpop.xlane.xlu1 %381 }
 0x25e   : > { %v430_v35 = vmax.f32 %v422_v30, 0.0  ;;  %v408_v36 = vmul.f32 0.03125, %v382_v31 }
 0x260   : > { %v446_v37 = vadd.f32 1e-05, %v430_v35  ;;  %v424_v38 = vsub.f32 %v408_v36, %v416_v32  ;;  %v449_v32 = vadd.f32 1e-05, %v433_v27 }
 0x261   : > { %v388_v39 = vpop.xlane.xlu1 %387 }
 0x262   : > { %961 = vrsqrt.f32 %v446_v37  ;;  %v432_v40 = vmax.f32 %v424_v38, 0.0  ;;  %v410_v41 = vmul.f32 0.03125, %v388_v39  ;;  %v629_v37 = vmul.f32 %v1362_v4, %v1362_v4 }
 0x264   : > { %v448_v42 = vadd.f32 1e-05, %v432_v40  ;;  %v426_v43 = vsub.f32 %v410_v41, %v418_v33 }
 0x265   : > { %v394_v44 = vpop.xlane.xlu1 %393 }
 0x266   : > { %963 = vrsqrt.f32 %v448_v42  ;;  %v434_v47 = vmax.f32 %v426_v43, 0.0  ;;  %v412_v50 = vmul.f32 0.03125, %v394_v44 }
 0x268   : > { %v450_v51 = vadd.f32 1e-05, %v434_v47  ;;  %v428_v53 = vsub.f32 %v412_v50, %v420_v45 }
 0x269   : > { %v538_v55 = vpop.xlane.xlu1 %537 }
 0x26a   : > { %965 = vrsqrt.f32 %v450_v51  ;;  %v436_v56 = vmax.f32 %v428_v53, 0.0  ;;  %v612_v8 = vmul.f32 0.03125, %v538_v55 }
 0x26c   : > { %v962_v57 = vpop.eup %961  ;;  %v452_v58 = vadd.f32 1e-05, %v436_v56  ;;  %v628_v12 = vmul.f32 %v612_v8, %v612_v8 }
 0x26d   : > { %v1338_v59 = vmul.f32 %v962_v57, %v438_v9  ;;  %v550_v60 = vpop.xlane.xlu1 %549 }
 0x26e   : > { %967 = vrsqrt.f32 %v452_v58  ;;  %v1370_v38 = vmul.f32 0.03125, %v550_v60 }
 0x270   : > { %v964_v61 = vpop.eup %963  ;;  %v632_v47 = vmul.f32 %v1370_v38, %v1370_v38 }
 0x271   : > { %v464_v63 = vmul.f32 %v964_v61, %v440_v54  ;;  %v532_v0 = vpop.xlane.xlu1 %531  ;;  %v652_v61 = vsub.f32 %v1196_v16, %v612_v8 }
 0x272   : > { %v610_v15 = vmul.f32 0.03125, %v532_v0 }
 0x274   : > { %v966_v2 = vpop.eup %965  ;;  %v626_v31 = vmul.f32 %v610_v15, %v610_v15  ;;  %v650_v16 = vsub.f32 %v1204_v18, %v610_v15  ;;  %v653_v18 = vsub.f32 %v1208_v20, %v1362_v4 }
 0x275   : > { %v1352_v7 = vmul.f32 %v966_v2, %v442_v5  ;;  %v544_v9 = vpop.xlane.xlu1 %543 }
 0x276   : > { %v1364_v5 = vmul.f32 0.03125, %v544_v9  ;;  %v478_v9 = vmul.f32 %v1380_v1, %v464_v63  ;;  %v476_v63 = vmul.f32 %v1380_v1, %v1338_v59 }
 0x278   : > { %v968_v10 = vpop.eup %967  ;;  %v630_v3 = vmul.f32 %v1364_v5, %v1364_v5 }
 0x279   : > { %v1357_v52 = vmul.f32 %v968_v10, %v444_v49  ;;  %v594_v46 = vpop.xlane.xlu1 %593  ;;  %v441_v10 = vsub.f32 %v1208_v20, %v1341_v62  ;;  %v480_v20 = vmul.f32 %v1380_v1, %v1352_v7 }
 0x27a   : > { %v1359_v54 = vpop.xlane.xlu0 %534  ;;  %v620_v25 = vmul.f32 0.03125, %v594_v46 }
 0x27c   : > { %v636_v28 = vsub.f32 %v620_v25, %v628_v12  ;;  %v1391_v12 = vld [vmem:[%s1539_s3] ss:$0 sm:$0xff] }
 0x27d   : > { %v492_v27 = vadd.f32 %v1391_v12, %v478_v9 }
 0x27e   : > { %v1366_v29 = vpop.xlane.xlu0 %546  ;;  %v588_v30 = vpop.xlane.xlu1 %587  ;;  %v644_v48 = vmax.f32 %v636_v28, 0.0 }
 0x27f   : > { %v618_v49 = vmul.f32 0.03125, %v588_v30 }
 0x280   : > { %v660_v35 = vadd.f32 1e-05, %v644_v48  ;;  %v654_v48 = vsub.f32 %v1206_v19, %v1364_v5  ;;  %v656_v19 = vsub.f32 %v1198_v17, %v1370_v38  ;;  %v494_v17 = vadd.f32 %v1391_v12, %v480_v20 }
 0x281   : > { %v634_v36 = vsub.f32 %v618_v49, %v626_v31 }
 0x282   : > { %v597_v39 = vpop.xlane.xlu0 %596  ;;  %v600_v33 = vpop.xlane.xlu1 %599  ;;  %969 = vrsqrt.f32 %v660_v35  ;;  %v490_v35 = vadd.f32 %v1391_v12, %v476_v63 }
 0x283   : > { %v642_v40 = vmax.f32 %v634_v36, 0.0  ;;  %v621_v41 = vmul.f32 0.03125, %v597_v39  ;;  %v622_v42 = vmul.f32 0.03125, %v600_v33  ;;  %971 = vrsqrt.f32 %v449_v32 }
 0x285   : > { %v658_v43 = vadd.f32 1e-05, %v642_v40  ;;  %v637_v44 = vsub.f32 %v621_v41, %v629_v37  ;;  %v638_v45 = vsub.f32 %v622_v42, %v630_v3  ;;  %v482_v41 = vmul.f32 %v1380_v1, %v1357_v52 }
 0x286   : > { %v606_v50 = vpop.xlane.xlu1 %605 }
 0x287   : > { %973 = vrsqrt.f32 %v658_v43  ;;  %v645_v51 = vmax.f32 %v637_v44, 0.0  ;;  %v646_v53 = vmax.f32 %v638_v45, 0.0  ;;  %v624_v55 = vmul.f32 0.03125, %v606_v50 }
 0x289   : > { %v661_v56 = vadd.f32 1e-05, %v645_v51  ;;  %v662_v57 = vadd.f32 1e-05, %v646_v53  ;;  %v640_v58 = vsub.f32 %v624_v55, %v632_v47  ;;  %v496_v51 = vadd.f32 %v1391_v12, %v482_v41 }
 0x28b   : > { %975 = vrsqrt.f32 %v661_v56  ;;  %v648_v60 = vmax.f32 %v640_v58, 0.0 }
 0x28c   : > { %977 = vrsqrt.f32 %v662_v57  ;;  %v970_v0 = vpop.eup %969  ;;  %v611_v57 = vmul.f32 0.03125, %v1359_v54 }
 0x28d   : > { %v664_v2 = vadd.f32 1e-05, %v648_v60  ;;  %v972_v6 = vpop.eup %971  ;;  %v676_v34 = vmul.f32 %v970_v0, %v652_v61  ;;  %v615_v61 = vmul.f32 0.03125, %v1366_v29 }
 0x28e   : > { %v465_v25 = vmul.f32 %v972_v6, %v441_v10  ;;  %v627_v60 = vmul.f32 %v611_v57, %v611_v57 }
 0x28f   : > { %979 = vrsqrt.f32 %v664_v2  ;;  %v684_v8 = vmul.f32 %v1380_v1, %v676_v34  ;;  %v631_v9 = vmul.f32 %v615_v61, %v615_v61 }
 0x290   : > { %v479_v59 = vmul.f32 %v1380_v1, %v465_v25  ;;  %v633_v25 = vmul.f32 %v1317_v11, %v1317_v11 }
 0x291   : > { %v974_v46 = vpop.eup %973  ;;  %v692_v62 = vadd.f32 %v1391_v12, %v684_v8 }
 0x292   : > { %v674_v28 = vmul.f32 %v974_v46, %v650_v16  ;;  %v493_v7 = vadd.f32 %v1391_v12, %v479_v59 }
 0x293   : > { %v700_v15 = vsel %vm341_vm1, %v492_v27, %v692_v62 }
 0x294   : > { %v682_v30 = vmul.f32 %v1380_v1, %v674_v28  ;;  %v708_v49 = vpack.c.bf16 %v700_v15, %v700_v15 }
 0x295   : > { %v976_v31 = vpop.eup %975 }
 0x296   : > { %v978_v32 = vpop.eup %977  ;;  %v690_v36 = vadd.f32 %v1391_v12, %v682_v30  ;;  %v677_v37 = vmul.f32 %v976_v31, %v653_v18  ;;  %717 = vst.msk [vmem:[%s1410_s11 + $0x8] sm:$0xf] %vm714_vm2, %v708_v49  ;;  %v651_v18 = vsub.f32 %v1212_v22, %v611_v57  ;;  %v477_v30 = vmul.f32 %v1380_v1, %v1323_v24 }
 0x297   : > { %v678_v4 = vmul.f32 %v978_v32, %v654_v48  ;;  %v655_v48 = vsub.f32 %v1214_v23, %v615_v61 }
 0x298   : > { %v698_v5 = vsel %vm341_vm1, %v490_v35, %v690_v36  ;;  %v685_v3 = vmul.f32 %v1380_v1, %v677_v37  ;;  %v491_v59 = vadd.f32 %v1391_v12, %v477_v30  ;;  %v481_v35 = vmul.f32 %v1380_v1, %v1325_v26 }
 0x299   : > { %v980_v39 = vpop.eup %979  ;;  %v706_v33 = vpack.c.bf16 %v698_v5, %v698_v5  ;;  %v686_v40 = vmul.f32 %v1380_v1, %v678_v4  ;;  %v483_v4 = vmul.f32 %v1380_v1, %v1321_v14 }
 0x29a   : > { %v693_v42 = vadd.f32 %v1391_v12, %v685_v3  ;;  %v680_v43 = vmul.f32 %v980_v39, %v656_v19  ;;  %v495_v19 = vadd.f32 %v1391_v12, %v481_v35 }
 0x29b   : > { %715 = vst.msk [vmem:[%s1410_s11] sm:$0xf] %vm714_vm2, %v706_v33  ;;  %v694_v38 = vadd.f32 %v1391_v12, %v686_v40  ;;  %v497_v14 = vadd.f32 %v1391_v12, %v483_v4 }
 0x29c   : > { %v701_v44 = vsel %vm341_vm1, %v493_v7, %v693_v42  ;;  %v688_v45 = vmul.f32 %v1380_v1, %v680_v43 }
 0x29d   : > { %v709_v47 = vpack.c.bf16 %v701_v44, %v701_v44  ;;  %v702_v50 = vsel %vm341_vm1, %v494_v17, %v694_v38 }
 0x29e   : > { %v710_v52 = vpack.c.bf16 %v702_v50, %v702_v50  ;;  %v696_v53 = vadd.f32 %v1391_v12, %v688_v45 }
 0x29f   : > { %718 = vst.msk [vmem:[%s1410_s11 + $0xc] sm:$0xf] %vm714_vm2, %v709_v47 }
 0x2a0   : > { %719 = vst.msk [vmem:[%s1410_s11 + $0x10] sm:$0xf] %vm714_vm2, %v710_v52  ;;  %v704_v55 = vsel %vm341_vm1, %v496_v51, %v696_v53 }
 0x2a1   : > { %v712_v56 = vpack.c.bf16 %v704_v55, %v704_v55 }
 0x2a3   : > { %721 = vst.msk [vmem:[%s1410_s11 + $0x18] sm:$0xf] %vm714_vm2, %v712_v56 }
 0x2b3   : > { %v591_v58 = vpop.xlane.xlu0 %590 }
 0x2b4   : > { %v619_v0 = vmul.f32 0.03125, %v591_v58 }
 0x2b6   : > { %v635_v2 = vsub.f32 %v619_v0, %v627_v60 }
 0x2b7   : > { %v603_v6 = vpop.xlane.xlu0 %602 }
 0x2b8   : > { %v643_v34 = vmax.f32 %v635_v2, 0.0  ;;  %v623_v10 = vmul.f32 0.03125, %v603_v6 }
 0x2ba   : > { %v659_v16 = vadd.f32 1e-05, %v643_v34  ;;  %v639_v8 = vsub.f32 %v623_v10, %v631_v9 }
 0x2bb   : > { %v609_v46 = vpop.xlane.xlu0 %608 }
 0x2bc   : > { %981 = vrsqrt.f32 %v659_v16  ;;  %v647_v63 = vmax.f32 %v639_v8, 0.0  ;;  %v625_v27 = vmul.f32 0.03125, %v609_v46 }
 0x2be   : > { %v663_v54 = vadd.f32 1e-05, %v647_v63  ;;  %v641_v62 = vsub.f32 %v625_v27, %v633_v25 }
 0x2c0   : > { %983 = vrsqrt.f32 %v663_v54  ;;  %v649_v29 = vmax.f32 %v641_v62, 0.0 }
 0x2c2   : > { %v665_v28 = vadd.f32 1e-05, %v649_v29 }
 0x2c4   : > { %985 = vrsqrt.f32 %v665_v28 }
 0x2c6   : > { %v982_v15 = vpop.eup %981 }
 0x2c7   : > { %v675_v31 = vmul.f32 %v982_v15, %v651_v18 }
 0x2c9   : > { %v683_v49 = vmul.f32 %v1380_v1, %v675_v31 }
 0x2ca   : > { %v984_v32 = vpop.eup %983 }
 0x2cb   : > { %v691_v36 = vadd.f32 %v1391_v12, %v683_v49  ;;  %v679_v22 = vmul.f32 %v984_v32, %v655_v48 }
 0x2cd   : > { %v699_v37 = vsel %vm341_vm1, %v491_v59, %v691_v36  ;;  %v687_v24 = vmul.f32 %v1380_v1, %v679_v22 }
 0x2ce   : > { %v986_v23 = vpop.eup %985  ;;  %v707_v20 = vpack.c.bf16 %v699_v37, %v699_v37 }
 0x2cf   : > { %v695_v26 = vadd.f32 %v1391_v12, %v687_v24  ;;  %v681_v5 = vmul.f32 %v986_v23, %v657_v13 }
 0x2d0   : > { %716 = vst.msk [vmem:[%s1410_s11 + $0x4] sm:$0xf] %vm714_vm2, %v707_v20 }
 0x2d1   : > { %v703_v3 = vsel %vm341_vm1, %v495_v19, %v695_v26  ;;  %v689_v39 = vmul.f32 %v1380_v1, %v681_v5 }
 0x2d2   : > { %v711_v33 = vpack.c.bf16 %v703_v3, %v703_v3 }
 0x2d3   : > { %v697_v40 = vadd.f32 %v1391_v12, %v689_v39 }
 0x2d4   : > { %720 = vst.msk [vmem:[%s1410_s11 + $0x14] sm:$0xf] %vm714_vm2, %v711_v33 }
 0x2d5   : > { %v705_v21 = vsel %vm341_vm1, %v497_v14, %v697_v40 }
 0x2d6   : > { %v713_v11 = vpack.c.bf16 %v705_v21, %v705_v21 }
 0x2d8   : > { %722 = vst.msk [vmem:[%s1410_s11 + $0x1c] sm:$0xf] %vm714_vm2, %v713_v11 }
 0x2d9   : > { %1000 = shalt.err (!%p997_p6)
}
 0x2da   : > { %s1001_s6 = scalar_lea.hbm %s1475_s24, 512  ;;  %s1005_s12 = scalar_lea.hbm %s1540_s4, 2048 }
 0x2db   : > { %p1002_p7 = scmp.ne.s32.totalorder %s1475_s24, %s1001_s6  ;;  %p1006_p11 = scmp.lt.u32.totalorder %s1475_s24, %s1540_s4 }
 0x2dc   : > { %p1007_p12 = scmp.lt.u32.totalorder %s1005_s12, %s1001_s6  ;;  %p1009_p0 = scmp.lt.u32.totalorder %s1001_s6, %s1475_s24 }
 0x2dd   : > { %p1003_p9 = pnand %p1002_p7, %p1164_p3 }
 0x2de   : > { %p1008_p13 = por %p1007_p12, %p1006_p11 }
 0x2df   : > { %p1004_p10 = pneg %p1003_p9 }
 0x2e0   : > { %p1010_p1 = por %p1009_p0, %p1008_p13 }
 0x2e2   : > { %p1011_p2 = pnand %p1010_p1, %p1004_p10 }
 0x2e4   : > { %1014 = shalt.err (!%p1011_p2)
}
 0x2e5   : > { %s1085_s14 = smov 64   ;;  %s1086_s23 = smov 128  }
 0x2e6   : > { %s1087_s30 = smov 4  }
 0x2e7   : > { %876 = dma.vmem_to_hbm [thread:$0]  (%p1164_p3), %s1478_s19, 512, %s1475_s24, %s1484_s27, %s1085_s14, %s1086_s23, %s1087_s30  }
 0x2e8 PF: > { %p882_p4 = scmp.ge.s32.totalorder %s1081_s22, 2  ;;  %s754_s5 = sand.u32 1, %s1053_s15  }
 0x2e9   : > { %s755_s8 = scalar_lea.sflag [#allocation3], %s754_s5 }
 0x2ea   : > { %p879_p5 = pnand %p882_p4, %p1173_p8 }
 0x2ec   : > { %1048 = dma.done.wait (!%p879_p5), %s755_s8, 512  }
 0x2ed   : > { %1050 = vsyncadd (!%p879_p5), %s755_s8, 4294966784  ;;  %s17_s22 = sadd.s32 1, %s1081_s22   ;;  %s1543_s15 = smov %s1057_s16 }
 0x2ee   : > { %p14_p6 = scmp.ge.s32.totalorder %s17_s22, 6   ;;  %s1544_s16 = smov %s1061_s17 }
 0x2ef   : > { %s1545_s17 = smov %s1182_s7  ;;  %s1546_s18 = smov %s1073_s20 }
 0x2f0   : > { %s1547_s19 = smov %s1077_s21  ;;  %s1548_s20 = smov %s1551_s25 }
 0x2f1   : > { %s1549_s21 = smov %s1555_s26  ;;  %16 = sbr.rel (!%p14_p6) target bundleno = 5 (0x5), region = 72 }
 0x2f8   :  { %760 = vsyncpa [#allocation3], 1 }
 0x2f9   :  { %762 = vsyncpa [#allocation3 + $0x1], 1 }

</bundles_post_ra>
